<compile_context>
chip_gen: v7x
topology: tpu7x:2x2x1
jax: 0.10.0
libtpu: 0.0.40
codegen_flags: <defaults>
</compile_context>

<pallas_src>
import functools
import math

import numpy as np
import jax
import jax.numpy as jnp
from jax import lax
from jax.experimental import pallas as pl
from jax.experimental.pallas import tpu as pltpu

# --- module hyper-parameters (from testLSTM.py) ------------------------------
hidden_size = 2
input_size = 5
num_classes = 2
num_layers = 2
seq_length = 1
FC1 = 128

# --- TPU padding / packed layout ----------------------------------------------
BP = 8        # batch padded to one sublane group (widen to 128/256 to fill MXU)
GP = 32       # each LSTM gate padded to a 32-lane chunk (4 gates -> 128 lanes)
ZW = 4 * GP   # 128: gate pre-activation width = exactly one vreg of lanes
IPAD = 32     # input features padded to 32 lanes
HPAD = 32     # hidden/cell state padded to 32 lanes
OUTW = 8      # output lanes (num_classes padded to 8)

assert BP == 8, "biases are replicated 8 rows wide at pack time"

# Row offsets inside the single packed (W_ROWS, 128) f32 weight blob.  Every
# section starts on a multiple of 8 sublanes and spans 128 lanes.
R_W0 = 0                       # (IPAD+HPAD, 128) fused [W_ih0 ; W_hh0], gate-packed
R_B0 = R_W0 + IPAD + HPAD      # 64   layer-0 bias, replicated across 8 rows
R_W1 = R_B0 + BP               # 72   (2*HPAD, 128) fused [W_ih1 ; W_hh1]
R_B1 = R_W1 + 2 * HPAD         # 136  layer-1 bias
R_WFC1 = R_B1 + BP             # 144  (HPAD, 128) fc_1 weight, transposed
R_BFC1 = R_WFC1 + HPAD         # 176  fc_1 bias
R_WFC = R_BFC1 + BP            # 184  (8, 128)   fc weight, NATURAL orientation
R_BFC = R_WFC + BP             # 192  fc bias (lanes 0..num_classes)
W_ROWS = R_BFC + BP            # 200 rows -> blob is (200, 128) f32 = 100 KiB


def lstm1_kernel(batch, x_ref, h0_ref, c0_ref, w_ref, out_ref, xh_ref, st_ref):
    """Whole LSTM1 forward for one padded batch, fully VMEM-resident, gridless."""
    # --- static, sublane-aligned slices of the packed weight blob -----------
    W0 = w_ref[R_W0:R_W0 + IPAD + HPAD, :]        # (64, 128)
    b0 = w_ref[R_B0:R_B0 + BP, :]                 # (8, 128)  pre-replicated
    W1 = w_ref[R_W1:R_W1 + 2 * HPAD, :]           # (64, 128)
    b1 = w_ref[R_B1:R_B1 + BP, :]                 # (8, 128)
    Wfc1 = w_ref[R_WFC1:R_WFC1 + HPAD, :]         # (32, 128)
    bfc1 = w_ref[R_BFC1:R_BFC1 + BP, :]           # (8, 128)
    Wfc = w_ref[R_WFC:R_WFC + BP, :]              # (8, 128)  natural (class, FC1)
    bfc = w_ref[R_BFC:R_BFC + BP, 0:OUTW]         # (8, 8)

    # --- zero the padding scratches: this IS the zero-padding invariant ------
    xh_ref[...] = jnp.zeros_like(xh_ref)          # (BP, IPAD+HPAD) fused LHS
    st_ref[...] = jnp.zeros_like(st_ref)          # (2*L*BP, HPAD)  h0/h1/c0/c1

    # place the real h_0 / c_0 values: rows [l*BP, l*BP+batch), lanes [0, hidden)
    for l in range(num_layers):
        st_ref[l * BP:l * BP + batch, 0:hidden_size] = h0_ref[l]
        st_ref[(num_layers + l) * BP:(num_layers + l) * BP + batch,
               0:hidden_size] = c0_ref[l]
    h = [st_ref[l * BP:(l + 1) * BP, :] for l in range(num_layers)]
    c = [st_ref[(num_layers + l) * BP:(num_layers + l + 1) * BP, :]
         for l in range(num_layers)]

    def cell(z, c_prev):
        # Full-width EUP passes, then 32-lane gate slices (PyTorch order i,f,g,o).
        # Padded lanes: z=0 -> sigmoid=0.5, tanh=0 -> c,h padding stays 0.
        s = jax.nn.sigmoid(z)
        th = jnp.tanh(z)
        i = s[:, 0 * GP:1 * GP]
        f = s[:, 1 * GP:2 * GP]
        g = th[:, 2 * GP:3 * GP]
        o = s[:, 3 * GP:4 * GP]
        c_new = f * c_prev + i * g
        h_new = o * jnp.tanh(c_new)
        return h_new, c_new

    # tiny static unroll over time
    for t in range(seq_length):
        # stage x_t into the padded fused-LHS scratch (per-row masked stores);
        # lanes [input_size, IPAD) and rows [batch, BP) remain zero.
        for b in range(batch):
            xh_ref[b:b + 1, 0:input_size] = x_ref[b, t:t + 1, :]
        xh_ref[:, IPAD:IPAD + HPAD] = h[0]
        # layer 0: one fused matmul  [x_t | h0] @ [W_ih0 ; W_hh0]
        z0 = jnp.dot(xh_ref[...], W0, preferred_element_type=jnp.float32) + b0
        h[0], c[0] = cell(z0, c[0])
        # layer 1: one fused matmul  [h0 | h1] @ [W_ih1 ; W_hh1]
        z1 = jnp.dot(jnp.concatenate([h[0], h[1]], axis=1), W1,
                     preferred_element_type=jnp.float32) + b1
        h[1], c[1] = cell(z1, c[1])

    # output[:, -1, :] == h1 after the last step; ReLU -> fc_1 -> ReLU -> fc
    hn = jnp.maximum(h[1], 0.0)
    f1 = jnp.maximum(
        jnp.dot(hn, Wfc1, preferred_element_type=jnp.float32) + bfc1, 0.0)
    # final layer: contract over lanes of both operands (A @ B.T, NT form)
    logits = lax.dot_general(f1, Wfc, (((1,), (1,)), ((), ())),
                             preferred_element_type=jnp.float32)   # (BP, 8)
    out_ref[...] = logits + bfc


# --- one-time host-side weight packing ----------------------------------------
def pack_params(p):
    """Pack all torch-layout weights into a single (W_ROWS, 128) f32 blob."""
    blob = np.zeros((W_ROWS, ZW), np.float32)

    def pack_gates_w(dst_row, w, in_dim):
        w = np.asarray(w, np.float32)              # (4H, in_dim), torch layout
        for g in range(4):
            blk = w[g * hidden_size:(g + 1) * hidden_size, :].T   # (in_dim, H)
            blob[dst_row:dst_row + in_dim, g * GP:g * GP + hidden_size] = blk

    def pack_gates_b(dst_row, b):
        b = np.asarray(b, np.float32)
        row = np.zeros((ZW,), np.float32)
        for g in range(4):
            row[g * GP:g * GP + hidden_size] = \
                b[g * hidden_size:(g + 1) * hidden_size]
        blob[dst_row:dst_row + BP, :] = row[None, :]   # replicate across 8 rows

    # layer 0: rows [0, IPAD) = input part, rows [IPAD, IPAD+HPAD) = hidden part
    pack_gates_w(R_W0, p["w_ih0"], input_size)
    pack_gates_w(R_W0 + IPAD, p["w_hh0"], hidden_size)
    pack_gates_b(R_B0, np.asarray(p["b_ih0"]) + np.asarray(p["b_hh0"]))
    # layer 1
    pack_gates_w(R_W1, p["w_ih1"], hidden_size)
    pack_gates_w(R_W1 + HPAD, p["w_hh1"], hidden_size)
    pack_gates_b(R_B1, np.asarray(p["b_ih1"]) + np.asarray(p["b_hh1"]))
    # fc_1: torch (128, 2) -> transposed (2, 128); padded input rows stay zero
    blob[R_WFC1:R_WFC1 + hidden_size, :] = np.asarray(p["w_fc1"], np.float32).T
    blob[R_BFC1:R_BFC1 + BP, :] = np.asarray(p["b_fc1"], np.float32)[None, :]
    # fc: NATURAL orientation (num_classes, 128) in the first rows
    blob[R_WFC:R_WFC + num_classes, :] = np.asarray(p["w_fc"], np.float32)
    blob[R_BFC:R_BFC + BP, :num_classes] = \
        np.asarray(p["b_fc"], np.float32)[None, :]
    return jnp.asarray(blob)


def init_params(key):
    """Deterministic torch-default-style initialization."""
    ks = jax.random.split(key, 12)
    k_lstm = 1.0 / math.sqrt(hidden_size)

    def u(kk, shape, bound):
        return jax.random.uniform(kk, shape, jnp.float32, -bound, bound)

    p = {}
    p["w_ih0"] = u(ks[0], (4 * hidden_size, input_size), k_lstm)
    p["w_hh0"] = u(ks[1], (4 * hidden_size, hidden_size), k_lstm)
    p["b_ih0"] = u(ks[2], (4 * hidden_size,), k_lstm)
    p["b_hh0"] = u(ks[3], (4 * hidden_size,), k_lstm)
    p["w_ih1"] = u(ks[4], (4 * hidden_size, hidden_size), k_lstm)
    p["w_hh1"] = u(ks[5], (4 * hidden_size, hidden_size), k_lstm)
    p["b_ih1"] = u(ks[6], (4 * hidden_size,), k_lstm)
    p["b_hh1"] = u(ks[7], (4 * hidden_size,), k_lstm)
    k_fc1 = 1.0 / math.sqrt(hidden_size)
    p["w_fc1"] = u(ks[8], (FC1, hidden_size), k_fc1)
    p["b_fc1"] = u(ks[9], (FC1,), k_fc1)
    k_fc = 1.0 / math.sqrt(FC1)
    p["w_fc"] = u(ks[10], (num_classes, FC1), k_fc)
    p["b_fc"] = u(ks[11], (num_classes,), k_fc)
    return p


@jax.jit
def lstm1_forward(x, h_0, c_0, w_blob):
    """x: (B, seq_length, input_size); h_0/c_0: (num_layers, B, hidden_size);
    w_blob: pre-packed (W_ROWS, 128) blob from pack_params().
    Returns the padded (BP, OUTW) logits slab; the consumer slices
    [:B, :num_classes] (fold the slice into the consumer, not the jit)."""
    B = x.shape[0]
    assert B <= BP and x.shape[1] == seq_length and x.shape[2] == input_size
    assert h_0.shape == (num_layers, B, hidden_size)
    assert c_0.shape == (num_layers, B, hidden_size)

    flops = (2 * seq_length * (BP * (IPAD + HPAD) * ZW + BP * 2 * HPAD * ZW)
             + 2 * BP * HPAD * ZW + 2 * BP * ZW * OUTW)
    transcendentals = seq_length * num_layers * (2 * BP * ZW + BP * GP)
    bytes_accessed = 4 * (W_ROWS * ZW + x.size + h_0.size + c_0.size + BP * OUTW)

    return pl.pallas_call(
        functools.partial(lstm1_kernel, B),
        out_shape=jax.ShapeDtypeStruct((BP, OUTW), jnp.float32),
        in_specs=[pl.BlockSpec(memory_space=pltpu.MemorySpace.VMEM)] * 4,
        out_specs=pl.BlockSpec(memory_space=pltpu.MemorySpace.VMEM),
        scratch_shapes=[pltpu.VMEM((BP, IPAD + HPAD), jnp.float32),
                        pltpu.VMEM((2 * num_layers * BP, HPAD), jnp.float32)],
        cost_estimate=pl.CostEstimate(flops=flops,
                                      transcendentals=transcendentals,
                                      bytes_accessed=bytes_accessed),
    )(x, h_0, c_0, w_blob)


# --- pure-JAX reference (for correctness check) --------------------------------
def lstm1_reference(x, h_0, c_0, p):
    h = [h_0[l] for l in range(num_layers)]
    c = [c_0[l] for l in range(num_layers)]

    def cell(x_in, h_prev, c_prev, w_ih, w_hh, b_ih, b_hh):
        z = x_in @ w_ih.T + h_prev @ w_hh.T + b_ih + b_hh
        i = jax.nn.sigmoid(z[:, 0 * hidden_size:1 * hidden_size])
        f = jax.nn.sigmoid(z[:, 1 * hidden_size:2 * hidden_size])
        g = jnp.tanh(z[:, 2 * hidden_size:3 * hidden_size])
        o = jax.nn.sigmoid(z[:, 3 * hidden_size:4 * hidden_size])
        c_new = f * c_prev + i * g
        return o * jnp.tanh(c_new), c_new

    for t in range(seq_length):
        xt = x[:, t, :]
        h[0], c[0] = cell(xt, h[0], c[0],
                          p["w_ih0"], p["w_hh0"], p["b_ih0"], p["b_hh0"])
        h[1], c[1] = cell(h[0], h[1], c[1],
                          p["w_ih1"], p["w_hh1"], p["b_ih1"], p["b_hh1"])
    out = jnp.maximum(h[1], 0.0)
    out = jnp.maximum(out @ p["w_fc1"].T + p["b_fc1"], 0.0)
    return out @ p["w_fc"].T + p["b_fc"]


if __name__ == "__main__":
    key = jax.random.PRNGKey(0)
    k_x, k_h, k_c, k_p = jax.random.split(key, 4)

    B = 2
    x = jax.random.normal(k_x, (B, seq_length, input_size), jnp.float32)
    # The PyTorch forward draws random h_0/c_0 each call; we draw them
    # deterministically here and pass them in explicitly.
    h_0 = jax.random.normal(k_h, (num_layers, B, hidden_size), jnp.float32)
    c_0 = jax.random.normal(k_c, (num_layers, B, hidden_size), jnp.float32)

    params = init_params(k_p)
    w_blob = pack_params(params)          # one-time host-side packing

    out_pad = lstm1_forward(x, h_0, c_0, w_blob)
    jax.block_until_ready(out_pad)
    out = out_pad[:B, :num_classes]       # slice folded into the consumer

    ref = lstm1_reference(x, h_0, c_0, params)
    assert out.shape == (B, num_classes)
    assert float(jnp.max(jnp.abs(out - ref))) < 1e-4
    print("KERNEL_OK")
</pallas_src>

<mosaic_0001>
module attributes {stable_mosaic.version = 11 : i64} {
  func.func @lstm1_kernel(%arg0: memref<2x1x5xf32, #tpu.memory_space<vmem>>, %arg1: memref<2x2x2xf32, #tpu.memory_space<vmem>>, %arg2: memref<2x2x2xf32, #tpu.memory_space<vmem>>, %arg3: memref<200x128xf32, #tpu.memory_space<vmem>>, %arg4: memref<8x8xf32, #tpu.memory_space<vmem>>, %arg5: memref<8x64xf32, #tpu.memory_space<vmem>>, %arg6: memref<32x32xf32, #tpu.memory_space<vmem>>) attributes {dimension_semantics = [], scalar_prefetch = 0 : i64, scratch_operands = 2 : i64, tpu.core_type = #tpu.core_type<tc>} {
    %c0 = arith.constant 0 : index
    %c0_0 = arith.constant 0 : index
    %0 = vector.load %arg3[%c0, %c0_0] : memref<200x128xf32, #tpu.memory_space<vmem>>, vector<64x128xf32>
    %c64 = arith.constant 64 : index
    %c0_1 = arith.constant 0 : index
    %1 = vector.load %arg3[%c64, %c0_1] : memref<200x128xf32, #tpu.memory_space<vmem>>, vector<8x128xf32>
    %c72 = arith.constant 72 : index
    %c0_2 = arith.constant 0 : index
    %2 = vector.load %arg3[%c72, %c0_2] : memref<200x128xf32, #tpu.memory_space<vmem>>, vector<64x128xf32>
    %c136 = arith.constant 136 : index
    %c0_3 = arith.constant 0 : index
    %3 = vector.load %arg3[%c136, %c0_3] : memref<200x128xf32, #tpu.memory_space<vmem>>, vector<8x128xf32>
    %c144 = arith.constant 144 : index
    %c0_4 = arith.constant 0 : index
    %4 = vector.load %arg3[%c144, %c0_4] : memref<200x128xf32, #tpu.memory_space<vmem>>, vector<32x128xf32>
    %c176 = arith.constant 176 : index
    %c0_5 = arith.constant 0 : index
    %5 = vector.load %arg3[%c176, %c0_5] : memref<200x128xf32, #tpu.memory_space<vmem>>, vector<8x128xf32>
    %c184 = arith.constant 184 : index
    %c0_6 = arith.constant 0 : index
    %6 = vector.load %arg3[%c184, %c0_6] : memref<200x128xf32, #tpu.memory_space<vmem>>, vector<8x128xf32>
    %c192 = arith.constant 192 : index
    %c0_7 = arith.constant 0 : index
    %7 = vector.load %arg3[%c192, %c0_7] : memref<200x128xf32, #tpu.memory_space<vmem>>, vector<8x8xf32>
    %cst = arith.constant 0.000000e+00 : f32
    %8 = vector.broadcast %cst : f32 to vector<8x64xf32>
    %c0_8 = arith.constant 0 : index
    %c0_9 = arith.constant 0 : index
    %9 = vector.load %arg5[%c0_8, %c0_9] : memref<8x64xf32, #tpu.memory_space<vmem>>, vector<8x64xf32>
    tpu.vector_store %arg5[%c0_8, %c0_9], %8 {strides = array<i32>} : memref<8x64xf32, #tpu.memory_space<vmem>>, vector<8x64xf32>,
    %cst_10 = arith.constant 0.000000e+00 : f32
    %10 = vector.broadcast %cst_10 : f32 to vector<32x32xf32>
    %c0_11 = arith.constant 0 : index
    %c0_12 = arith.constant 0 : index
    %11 = vector.load %arg6[%c0_11, %c0_12] : memref<32x32xf32, #tpu.memory_space<vmem>>, vector<32x32xf32>
    tpu.vector_store %arg6[%c0_11, %c0_12], %10 {strides = array<i32>} : memref<32x32xf32, #tpu.memory_space<vmem>>, vector<32x32xf32>,
    %c0_13 = arith.constant 0 : index
    %c0_14 = arith.constant 0 : index
    %c0_15 = arith.constant 0 : index
    %12 = vector.load %arg1[%c0_13, %c0_14, %c0_15] : memref<2x2x2xf32, #tpu.memory_space<vmem>>, vector<1x2x2xf32>
    %13 = vector.shape_cast %12 : vector<1x2x2xf32> to vector<2x2xf32>
    %c0_16 = arith.constant 0 : index
    %c0_17 = arith.constant 0 : index
    %14 = vector.load %arg6[%c0_16, %c0_17] : memref<32x32xf32, #tpu.memory_space<vmem>>, vector<2x2xf32>
    tpu.vector_store %arg6[%c0_16, %c0_17], %13 {strides = array<i32>} : memref<32x32xf32, #tpu.memory_space<vmem>>, vector<2x2xf32>,
    %c0_18 = arith.constant 0 : index
    %c0_19 = arith.constant 0 : index
    %c0_20 = arith.constant 0 : index
    %15 = vector.load %arg2[%c0_18, %c0_19, %c0_20] : memref<2x2x2xf32, #tpu.memory_space<vmem>>, vector<1x2x2xf32>
    %16 = vector.shape_cast %15 : vector<1x2x2xf32> to vector<2x2xf32>
    %c16 = arith.constant 16 : index
    %c0_21 = arith.constant 0 : index
    %17 = vector.load %arg6[%c16, %c0_21] : memref<32x32xf32, #tpu.memory_space<vmem>>, vector<2x2xf32>
    tpu.vector_store %arg6[%c16, %c0_21], %16 {strides = array<i32>} : memref<32x32xf32, #tpu.memory_space<vmem>>, vector<2x2xf32>,
    %c1 = arith.constant 1 : index
    %c0_22 = arith.constant 0 : index
    %c0_23 = arith.constant 0 : index
    %18 = vector.load %arg1[%c1, %c0_22, %c0_23] : memref<2x2x2xf32, #tpu.memory_space<vmem>>, vector<1x2x2xf32>
    %19 = vector.shape_cast %18 : vector<1x2x2xf32> to vector<2x2xf32>
    %c8 = arith.constant 8 : index
    %c0_24 = arith.constant 0 : index
    %20 = vector.load %arg6[%c8, %c0_24] : memref<32x32xf32, #tpu.memory_space<vmem>>, vector<2x2xf32>
    tpu.vector_store %arg6[%c8, %c0_24], %19 {strides = array<i32>} : memref<32x32xf32, #tpu.memory_space<vmem>>, vector<2x2xf32>,
    %c1_25 = arith.constant 1 : index
    %c0_26 = arith.constant 0 : index
    %c0_27 = arith.constant 0 : index
    %21 = vector.load %arg2[%c1_25, %c0_26, %c0_27] : memref<2x2x2xf32, #tpu.memory_space<vmem>>, vector<1x2x2xf32>
    %22 = vector.shape_cast %21 : vector<1x2x2xf32> to vector<2x2xf32>
    %c24 = arith.constant 24 : index
    %c0_28 = arith.constant 0 : index
    %23 = vector.load %arg6[%c24, %c0_28] : memref<32x32xf32, #tpu.memory_space<vmem>>, vector<2x2xf32>
    tpu.vector_store %arg6[%c24, %c0_28], %22 {strides = array<i32>} : memref<32x32xf32, #tpu.memory_space<vmem>>, vector<2x2xf32>,
    %c0_29 = arith.constant 0 : index
    %c0_30 = arith.constant 0 : index
    %24 = vector.load %arg6[%c0_29, %c0_30] : memref<32x32xf32, #tpu.memory_space<vmem>>, vector<8x32xf32>
    %c8_31 = arith.constant 8 : index
    %c0_32 = arith.constant 0 : index
    %25 = vector.load %arg6[%c8_31, %c0_32] : memref<32x32xf32, #tpu.memory_space<vmem>>, vector<8x32xf32>
    %c16_33 = arith.constant 16 : index
    %c0_34 = arith.constant 0 : index
    %26 = vector.load %arg6[%c16_33, %c0_34] : memref<32x32xf32, #tpu.memory_space<vmem>>, vector<8x32xf32>
    %c24_35 = arith.constant 24 : index
    %c0_36 = arith.constant 0 : index
    %27 = vector.load %arg6[%c24_35, %c0_36] : memref<32x32xf32, #tpu.memory_space<vmem>>, vector<8x32xf32>
    %c0_37 = arith.constant 0 : index
    %c0_38 = arith.constant 0 : index
    %c0_39 = arith.constant 0 : index
    %28 = vector.load %arg0[%c0_37, %c0_38, %c0_39] : memref<2x1x5xf32, #tpu.memory_space<vmem>>, vector<1x1x5xf32>
    %29 = vector.shape_cast %28 : vector<1x1x5xf32> to vector<1x5xf32>
    %c0_40 = arith.constant 0 : index
    %c0_41 = arith.constant 0 : index
    %30 = vector.load %arg5[%c0_40, %c0_41] : memref<8x64xf32, #tpu.memory_space<vmem>>, vector<1x5xf32>
    tpu.vector_store %arg5[%c0_40, %c0_41], %29 {strides = array<i32>} : memref<8x64xf32, #tpu.memory_space<vmem>>, vector<1x5xf32>,
    %c1_42 = arith.constant 1 : index
    %c0_43 = arith.constant 0 : index
    %c0_44 = arith.constant 0 : index
    %31 = vector.load %arg0[%c1_42, %c0_43, %c0_44] : memref<2x1x5xf32, #tpu.memory_space<vmem>>, vector<1x1x5xf32>
    %32 = vector.shape_cast %31 : vector<1x1x5xf32> to vector<1x5xf32>
    %c1_45 = arith.constant 1 : index
    %c0_46 = arith.constant 0 : index
    %33 = vector.load %arg5[%c1_45, %c0_46] : memref<8x64xf32, #tpu.memory_space<vmem>>, vector<1x5xf32>
    tpu.vector_store %arg5[%c1_45, %c0_46], %32 {strides = array<i32>} : memref<8x64xf32, #tpu.memory_space<vmem>>, vector<1x5xf32>,
    %c0_47 = arith.constant 0 : index
    %c32 = arith.constant 32 : index
    %34 = vector.load %arg5[%c0_47, %c32] : memref<8x64xf32, #tpu.memory_space<vmem>>, vector<8x32xf32>
    tpu.vector_store %arg5[%c0_47, %c32], %24 {strides = array<i32>} : memref<8x64xf32, #tpu.memory_space<vmem>>, vector<8x32xf32>,
    %c0_48 = arith.constant 0 : index
    %c0_49 = arith.constant 0 : index
    %35 = vector.load %arg5[%c0_48, %c0_49] : memref<8x64xf32, #tpu.memory_space<vmem>>, vector<8x64xf32>
    %cst_50 = arith.constant dense<0.000000e+00> : vector<8x128xf32>
    %36 = tpu.matmul %35, %0, %cst_50 {dimension_numbers = #tpu.dot_dimension_numbers<[1], [0], [0], [1], [0, 0, 1, 1], [], []>} : vector<8x64xf32>, vector<64x128xf32>, vector<8x128xf32> -> vector<8x128xf32>
    %37 = arith.addf %36, %1 : vector<8x128xf32>
    %38 = arith.negf %37 : vector<8x128xf32>
    %39 = math.exp %38 : vector<8x128xf32>
    %cst_51 = arith.constant 1.000000e+00 : f32
    %40 = vector.broadcast %cst_51 : f32 to vector<8x128xf32>
    %41 = arith.addf %40, %39 : vector<8x128xf32>
    %42 = arith.divf %40, %41 : vector<8x128xf32>
    %43 = math.tanh %37 : vector<8x128xf32>
    %44 = vector.extract_strided_slice %42 {offsets = [0, 0], sizes = [8, 32], strides = [1, 1]} : vector<8x128xf32> to vector<8x32xf32>
    %45 = vector.extract_strided_slice %42 {offsets = [0, 32], sizes = [8, 32], strides = [1, 1]} : vector<8x128xf32> to vector<8x32xf32>
    %46 = vector.extract_strided_slice %43 {offsets = [0, 64], sizes = [8, 32], strides = [1, 1]} : vector<8x128xf32> to vector<8x32xf32>
    %47 = vector.extract_strided_slice %42 {offsets = [0, 96], sizes = [8, 32], strides = [1, 1]} : vector<8x128xf32> to vector<8x32xf32>
    %48 = arith.mulf %45, %26 : vector<8x32xf32>
    %49 = arith.mulf %44, %46 : vector<8x32xf32>
    %50 = arith.addf %48, %49 : vector<8x32xf32>
    %51 = math.tanh %50 : vector<8x32xf32>
    %52 = arith.mulf %47, %51 : vector<8x32xf32>
    %53 = tpu.concatenate %52, %25 in 1 : vector<8x32xf32>, vector<8x32xf32> -> vector<8x64xf32>
    %cst_52 = arith.constant dense<0.000000e+00> : vector<8x128xf32>
    %54 = tpu.matmul %53, %2, %cst_52 {dimension_numbers = #tpu.dot_dimension_numbers<[1], [0], [0], [1], [0, 0, 1, 1], [], []>} : vector<8x64xf32>, vector<64x128xf32>, vector<8x128xf32> -> vector<8x128xf32>
    %55 = arith.addf %54, %3 : vector<8x128xf32>
    %56 = arith.negf %55 : vector<8x128xf32>
    %57 = math.exp %56 : vector<8x128xf32>
    %cst_53 = arith.constant 1.000000e+00 : f32
    %58 = vector.broadcast %cst_53 : f32 to vector<8x128xf32>
    %59 = arith.addf %58, %57 : vector<8x128xf32>
    %60 = arith.divf %58, %59 : vector<8x128xf32>
    %61 = math.tanh %55 : vector<8x128xf32>
    %62 = vector.extract_strided_slice %60 {offsets = [0, 0], sizes = [8, 32], strides = [1, 1]} : vector<8x128xf32> to vector<8x32xf32>
    %63 = vector.extract_strided_slice %60 {offsets = [0, 32], sizes = [8, 32], strides = [1, 1]} : vector<8x128xf32> to vector<8x32xf32>
    %64 = vector.extract_strided_slice %61 {offsets = [0, 64], sizes = [8, 32], strides = [1, 1]} : vector<8x128xf32> to vector<8x32xf32>
    %65 = vector.extract_strided_slice %60 {offsets = [0, 96], sizes = [8, 32], strides = [1, 1]} : vector<8x128xf32> to vector<8x32xf32>
    %66 = arith.mulf %63, %27 : vector<8x32xf32>
    %67 = arith.mulf %62, %64 : vector<8x32xf32>
    %68 = arith.addf %66, %67 : vector<8x32xf32>
    %69 = math.tanh %68 : vector<8x32xf32>
    %70 = arith.mulf %65, %69 : vector<8x32xf32>
    %cst_54 = arith.constant 0.000000e+00 : f32
    %71 = vector.broadcast %cst_54 : f32 to vector<8x32xf32>
    %72 = arith.maximumf %70, %71 : vector<8x32xf32>
    %cst_55 = arith.constant dense<0.000000e+00> : vector<8x128xf32>
    %73 = tpu.matmul %72, %4, %cst_55 {dimension_numbers = #tpu.dot_dimension_numbers<[1], [0], [0], [1], [0, 0, 1, 1], [], []>} : vector<8x32xf32>, vector<32x128xf32>, vector<8x128xf32> -> vector<8x128xf32>
    %74 = arith.addf %73, %5 : vector<8x128xf32>
    %cst_56 = arith.constant 0.000000e+00 : f32
    %75 = vector.broadcast %cst_56 : f32 to vector<8x128xf32>
    %76 = arith.maximumf %74, %75 : vector<8x128xf32>
    %cst_57 = arith.constant dense<0.000000e+00> : vector<8x8xf32>
    %77 = tpu.matmul %76, %6, %cst_57 {dimension_numbers = #tpu.dot_dimension_numbers<[1], [1], [0], [0], [0, 0, 1, 0], [], []>} : vector<8x128xf32>, vector<8x128xf32>, vector<8x8xf32> -> vector<8x8xf32>
    %78 = arith.addf %77, %7 : vector<8x8xf32>
    %c0_58 = arith.constant 0 : index
    %c0_59 = arith.constant 0 : index
    %79 = vector.load %arg4[%c0_58, %c0_59] : memref<8x8xf32, #tpu.memory_space<vmem>>, vector<8x8xf32>
    tpu.vector_store %arg4[%c0_58, %c0_59], %78 {strides = array<i32>} : memref<8x8xf32, #tpu.memory_space<vmem>>, vector<8x8xf32>,
    return
  }
}

</mosaic_0001>

<bundles_post_ra>
// kernel: lstm1_forward.1
= control target key start
LH: loop header
LB: loop body
LE: loop exit
PB: predicated region body
PF: predicated region fallthrough
CT: control target
= control target key end

     0   :  { %9 = vsyncpa [#allocation5], 0  ;;  %s878_s0 = inlined_call_operand.hbm [shape: f32[2,1,5], index: 0, kind: input, shape index: {}]   ;;  %s879_s1 = inlined_call_operand.hbm [shape: f32[2,2,2], index: 1, kind: input, shape index: {}]   ;;  %s880_s2 = inlined_call_operand.vmem [shape: f32[2,2,2], index: 2, kind: input, shape index: {}]   ;;  %s881_s3 = inlined_call_operand.hbm [shape: f32[200,128], index: 3, kind: input, shape index: {}]   ;;  %s882_s4 = inlined_call_operand.hbm [shape: f32[8,8], index: 4, kind: output, shape index: {}]  }
   0x1   :  { %10 = vsyncpa [#allocation8], 0 }
   0x2   :  { %11 = vsyncpa [#allocation6], 0  ;;  %s734_s15 = smov [#allocation7]   ;;  %s640_s19 = scalar_lea.hbm %s879_s1, 64 }
   0x3   :  { %s29_s16 = sshll.u32 %s734_s15, 4  ;;  %p641_p0 = scmp.ne.s32.totalorder %s879_s1, %s640_s19  ;;  %s30_s16 = int_to_ptr.vmem [resolvable:$true] %s29_s16 }
   0x4   :  { %p644_p1 = scmp.lt.u32.totalorder %s640_s19, %s879_s1 }
   0x6   :  { %p646_p2 = pnand %p644_p1, %p641_p0 }
   0x8   :  { %649 = shalt.err (!%p646_p2)
}
   0x9   :  { %s650_s24 = scalar_lea.vmem %s30_s16, 64  ;;  %p655_p4 = scmp.lt.s32.totalorder %s30_s16, %s30_s16 }
   0xa   :  { %p651_p3 = scmp.ne.s32.totalorder %s30_s16, %s650_s24  ;;  %p656_p5 = scmp.lt.s32.totalorder %s650_s24, %s650_s24 }
   0xc   :  { %p657_p6 = por %p656_p5, %p655_p4 }
   0xe   :  { %p658_p7 = pnand %p657_p6, %p651_p3 }
  0x10   :  { %661 = shalt.err (!%p658_p7)
}
  0x11   :  { %s735_s25 = smov 32   ;;  %s736_s26 = smov 2  }
  0x12   :  { %35 = dma.hbm_to_vmem [thread:$0]  %s879_s1, 64, %s30_s16, [#allocation8], %s735_s25, %s735_s25, %s736_s26  }
  0x13   :  { %s737_s29 = smov [#allocation4]   ;;  %s662_s7 = scalar_lea.hbm %s878_s0, 32 }
  0x14   :  { %s17_s30 = sshll.u32 %s737_s29, 4  ;;  %p663_p8 = scmp.ne.s32.totalorder %s878_s0, %s662_s7  ;;  %s18_s30 = int_to_ptr.vmem [resolvable:$true] %s17_s30 }
  0x15   :  { %p666_p9 = scmp.lt.u32.totalorder %s662_s7, %s878_s0 }
  0x17   :  { %p668_p10 = pnand %p666_p9, %p663_p8 }
  0x19   :  { %671 = shalt.err (!%p668_p10)
}
  0x1a   :  { %s672_s12 = scalar_lea.vmem %s18_s30, 32  ;;  %p677_p12 = scmp.lt.s32.totalorder %s18_s30, %s18_s30 }
  0x1b   :  { %p673_p11 = scmp.ne.s32.totalorder %s18_s30, %s672_s12  ;;  %p678_p13 = scmp.lt.s32.totalorder %s672_s12, %s672_s12 }
  0x1d   :  { %p679_p0 = por %p678_p13, %p677_p12 }
  0x1f   :  { %p680_p1 = pnand %p679_p0, %p673_p11 }
  0x21   :  { %683 = shalt.err (!%p680_p1)
}
  0x22   :  { %s738_s1 = smov 16   ;;  %s739_s13 = smov 1  }
  0x23   :  { %23 = dma.hbm_to_vmem [thread:$0]  %s878_s0, 32, %s18_s30, [#allocation5], %s738_s1, %s738_s1, %s739_s13  }
  0x24   :  { %s740_s16 = smov [#allocation9]   ;;  %s684_s20 = scalar_lea.hbm %s881_s3, 3200 }
  0x25   :  { %s43_s17 = sshll.u32 %s740_s16, 4  ;;  %p685_p2 = scmp.ne.s32.totalorder %s881_s3, %s684_s20  ;;  %s44_s17 = int_to_ptr.vmem [resolvable:$true] %s43_s17 }
  0x26   :  { %p688_p3 = scmp.lt.u32.totalorder %s684_s20, %s881_s3 }
  0x28   :  { %p690_p4 = pnand %p688_p3, %p685_p2 }
  0x2a   :  { %693 = shalt.err (!%p690_p4)
}
  0x2b   :  { %s694_s26 = scalar_lea.vmem %s44_s17, 3200  ;;  %p699_p6 = scmp.lt.s32.totalorder %s44_s17, %s44_s17 }
  0x2c   :  { %p695_p5 = scmp.ne.s32.totalorder %s44_s17, %s694_s26  ;;  %p700_p7 = scmp.lt.s32.totalorder %s694_s26, %s694_s26 }
  0x2e   :  { %p701_p8 = por %p700_p7, %p699_p6 }
  0x30   :  { %p702_p9 = pnand %p701_p8, %p695_p5 }
  0x32   :  { %705 = shalt.err (!%p702_p9)
}
  0x33   :  { %s741_s0 = smov 128   ;;  %s742_s27 = smov 8  }
  0x34   :  { %49 = dma.hbm_to_vmem [thread:$0]  %s881_s3, 3200, %s44_s17, [#allocation8], %s741_s0, %s741_s0, %s742_s27  }
  0x35   :  { %728 = dma.done.wait [#allocation5], 32  }
  0x36   :  { %729 = vsyncadd [#allocation5], 4294967264 }
  0x37   :  { %730 = dma.done.wait [#allocation8], 3264  }
  0x38   :  { %731 = vsyncadd [#allocation8], 4294964032  ;;  %vm86_vm0 = vcmask 261120   ;;  %v743_v0 = vmov 0.0   ;;  %v744_v1 = vmov 0.0|0.0   ;;  %vm84_vm1 = vcmask 523264  }
  0x39   :  { %87 = vst.msk [vmem:[#allocation3] sm:$0xff] %vm86_vm0, %v743_v0  ;;  %88 = vst.msk [vmem:[#allocation3 + $0x8] sm:$0xff] %vm86_vm0, %v743_v0  ;;  %580 = vmatprep.subr.bf16.mxu0 %v744_v1  ;;  %592 = vmatprep.subr.bf16.mxu1 %v744_v1  ;;  %vm745_vm2 = vmmov 0   ;;  %vm92_vm3 = vcmask 9216   ;;  %v91_v2 = vld [vmem:[#allocation7] sm:$0x3] }
  0x3a   :  { %89 = vst.msk [vmem:[#allocation3 + $0x10] sm:$0xff] %vm86_vm0, %v743_v0  ;;  %90 = vst.msk [vmem:[#allocation3 + $0x18] sm:$0xff] %vm86_vm0, %v743_v0  ;;  %542 = vmatprep.mubr.msk.f32.mxu0 %vm745_vm2, %v743_v0  ;;  %561 = vmatprep.mubr.msk.f32.mxu1 %vm745_vm2, %v743_v0  ;;  %v59_v3 = vld [vmem:[#allocation9] sm:$0xff]  ;;  %v60_v4 = vld [vmem:[#allocation9 + $0x8] sm:$0xff]  ;;  %vm107_vm4 = vcmask 32768   ;;  %vm116_vm5 = vcmask 523520  }
  0x3b   :  { %85 = vst.msk [vmem:[#allocation2] sm:$0xff] %vm84_vm1, %v743_v0  ;;  %v581_v5 = vpack.c.bf16 %v60_v4, %v59_v3  ;;  %v61_v6 = vld [vmem:[#allocation9 + $0x10] sm:$0xff]  ;;  %v62_v7 = vld [vmem:[#allocation9 + $0x18] sm:$0xff]  ;;  %v63_v11 = vld [vmem:[#allocation9 + $0x20] sm:$0xff]  ;;  %s746_s5 = smov 64   ;;  %vm477_vm6 = vcmask 64512  }
  0x3c   :  { %93 = vst.msk [vmem:[#allocation3] sm:$0x3] %vm92_vm3, %v91_v2  ;;  %v584_v8 = vpack.c.bf16 %v62_v7, %v61_v6  ;;  %v106_v9 = vld [vmem:[#allocation4] sm:$0x1]  ;;  %v110_v10 = vld [vmem:[#allocation4 + $0x1] sm:$0x1] }
  0x3d   :  { %582 = vmatpush3.bf16.msra.mxu0 %v581_v5  ;;  %v64_v12 = vld [vmem:[#allocation9 + $0x28] sm:$0xff]  ;;  %108 = vst.msk [vmem:[#allocation2] sm:$0x1] %vm107_vm4, %v106_v9  ;;  %111 = vst.msk [vmem:[#allocation2 + $0x1] sm:$0x1] %vm107_vm4, %v110_v10  ;;  %v65_v16 = vld [vmem:[#allocation9 + $0x30] sm:$0xff] }
  0x3e   :  { %583 = vmatprep.subr.bf16.mxu0 %v744_v1  ;;  %v94_v13 = vld [vmem:[%s880_s2] sm:$0x3]  ;;  %v587_v14 = vpack.c.bf16 %v64_v12, %v63_v11  ;;  %v66_v17 = vld [vmem:[#allocation9 + $0x38] sm:$0xff]  ;;  %v67_v22 = vld [vmem:[#allocation9 + $0x40] sm:$0xff] }
  0x3f   :  { %95 = vst.msk [vmem:[#allocation3 + $0x10] sm:$0x3] %vm92_vm3, %v94_v13  ;;  %v590_v18 = vpack.c.bf16 %v66_v17, %v65_v16  ;;  %v97_v33 = vld [vmem:[#allocation7 + $0x2] sm:$0x3]  ;;  %v68_v38 = vld [vmem:[#allocation9 + $0x48] sm:$0xff]  ;;  %v69_v39 = vld [vmem:[#allocation9 + $0x50] sm:$0xff] }
  0x40   :  { %98 = vst.msk [vmem:[#allocation3 + $0x8] sm:$0x3] %vm92_vm3, %v97_v33  ;;  %v70_v40 = vld [vmem:[#allocation9 + $0x58] sm:$0xff]  ;;  %v593_v41 = vpack.c.bf16 %v69_v39, %v68_v38  ;;  %v71_v42 = vld [vmem:[#allocation9 + $0x60] sm:$0xff]  ;;  %v72_v44 = vld [vmem:[#allocation9 + $0x68] sm:$0xff] }
  0x41   :  { %585 = vmatpush3.bf16.msra.mxu0 %v584_v8  ;;  %v596_v43 = vpack.c.bf16 %v71_v42, %v70_v40  ;;  %v73_v45 = vld [vmem:[#allocation9 + $0x70] sm:$0xff]  ;;  %v74_v47 = vld [vmem:[#allocation9 + $0x78] sm:$0xff]  ;;  %v75_v48 = vld [vmem:[#allocation9 + $0x80] sm:$0xff] }
  0x42   :  { %586 = vmatprep.subr.bf16.mxu0 %v744_v1  ;;  %594 = vmatpush3.bf16.msra.mxu1 %v593_v41  ;;  %v599_v46 = vpack.c.bf16 %v73_v45, %v72_v44  ;;  %v602_v50 = vpack.c.bf16 %v75_v48, %v74_v47  ;;  %v495_v52 = vld [vmem:[%s880_s2 + $0x2] sm:$0x3]  ;;  %v77_v11 = vld [vmem:[#allocation9 + $0x90] sm:$0xff]  ;;  %v78_v12 = vld [vmem:[#allocation9 + $0x98] sm:$0xff]  ;;  %s747_s2 = smov [#allocation10]  }
  0x43   :  { %v102_v15 = vld [vmem:[#allocation3] sm:$0xff]  ;;  %595 = vmatprep.subr.bf16.mxu1 %v744_v1  ;;  %101 = vst.msk [vmem:[#allocation3 + $0x18] sm:$0x3] %vm92_vm3, %v495_v52  ;;  %v76_v59 = vld [vmem:[#allocation9 + $0x88] sm:$0xff]  ;;  %s485_s8 = sshll.u32 %s747_s2, 4  ;;  %s486_s8 = int_to_ptr.vmem [resolvable:$true] %s485_s8 }
  0x44   :  { %113 = vrot.lane.b32.xlu0 %v102_v15, %s735_s25  ;;  %v79_v13 = vld [vmem:[#allocation9 + $0xa0] sm:$0xff]  ;;  %v80_v15 = vld [vmem:[#allocation9 + $0xa8] sm:$0xff]  ;;  %p711_p11 = scmp.lt.s32.totalorder %s486_s8, %s486_s8 }
  0x45   :  { %588 = vmatpush3.bf16.msra.mxu0 %v587_v14  ;;  %v605_v14 = vpack.c.bf16 %v78_v12, %v77_v11  ;;  %v608_v16 = vpack.c.bf16 %v80_v15, %v79_v13 }
  0x46   :  { %589 = vmatprep.subr.bf16.mxu0 %v744_v1  ;;  %v104_v19 = vld [vmem:[#allocation3 + $0x10] sm:$0xff]  ;;  %597 = vmatpush3.bf16.msra.mxu1 %v596_v43 }
  0x47   :  { %200 = vrot.lane.b32.xlu1 %v104_v19, %s735_s25  ;;  %598 = vmatprep.subr.bf16.mxu1 %v744_v1  ;;  %v103_v51 = vld [vmem:[#allocation3 + $0x8] sm:$0xff] }
  0x49   :  { %591 = vmatpush3.bf16.msra.mxu0 %v590_v18 }
  0x4a   :  { %604 = vmatprep.subr.bf16.mxu0 %v744_v1  ;;  %600 = vmatpush3.bf16.msra.mxu1 %v599_v46  ;;  %v105_v53 = vld [vmem:[#allocation3 + $0x18] sm:$0xff] }
  0x4b   :  { %601 = vmatprep.subr.bf16.mxu1 %v744_v1 }
  0x4e   :  { %603 = vmatpush3.bf16.msra.mxu1 %v602_v50 }
  0x4f   :  { %575 = vmatprep.subr.mxu1 %v743_v0 }
  0xb6   :  { %v114_v20 = vpop.permute.xlu0 %113 }
  0xb7   :  { %117 = vst.msk [vmem:[#allocation2] sm:$0xff] %vm116_vm5, %v114_v20 }
  0xb9   :  { %v201_v34 = vpop.permute.xlu1 %200 }
  0xbe   :  { %v118_v21 = vld [vmem:[#allocation2] sm:$0xff] }
  0xbf   :  { %543 = vmatmul.mubr.msk.f32.vlgmr.msra.gmra.mrb[0].mxu0 %vm84_vm1, %v118_v21 }
  0xc0   :  { %572 = vmatprep.mubr.msk.f32.mxu0 %vm745_vm2, %v743_v0  ;;  %606 = vmatpush3.bf16.msra.mxu0 %v605_v14 }
  0xc1   :  { %607 = vmatprep.subr.bf16.mxu0 %v744_v1  ;;  %v83_v1 = vld [vmem:[#allocation9 + $0xc0] sm:$0xff] }
  0xc4   :  { %609 = vmatpush3.bf16.msra.mxu0 %v608_v16 }
 0x192   :  { %v188_v23 = vpop.f32.mrb[0].mxu0 }
 0x193   :  { %v189_v24 = vadd.f32 %v188_v23, %v67_v22  ;;  %v544_v25 = vpop.f32.mrb[1].mxu0  ;;  %v82_v22 = vld [vmem:[#allocation9 + $0xb8] sm:$0xff]  ;;  %v81_v23 = vld [vmem:[#allocation9 + $0xb0] sm:$0xff] }
 0x195   :  { %624 = vtanh.f32 %v189_v24  ;;  %v497_v27 = vmul.f32 -1.442695, %v189_v24 }
 0x197   :  { %626 = vpow2.f32 %v497_v27 }
 0x19f   :  { %v625_v26 = vpop.eup %624 }
 0x1a0   :  { %205 = vrot.lane.b32.xlu0 %v625_v26, %s746_s5 }
 0x1a1   :  { %v627_v28 = vpop.eup %626 }
 0x1a2   :  { %v195_v29 = vadd.f32 1.0, %v627_v28 }
 0x1a4   :  { %628 = vrcp.f32 %v195_v29 }
 0x1ae   :  { %v629_v30 = vpop.eup %628 }
 0x1af   :  { %v203_v35 = vmul.f32 %v629_v30, %v201_v34 }
 0x212   :  { %v206_v31 = vpop.permute.xlu0 %205 }
 0x213   :  { %v208_v32 = vmul.f32 %v629_v30, %v206_v31 }
 0x215   :  { %210 = vrot.lane.b32.xlu1 %v208_v32, %s735_s25 }
 0x287   :  { %v211_v36 = vpop.permute.xlu1 %210 }
 0x288   :  { %v213_v37 = vadd.f32 %v211_v36, %v203_v35 }
 0x28a   :  { %630 = vtanh.f32 %v213_v37 }
 0x294   :  { %v631_v49 = vpop.eup %630 }
 0x295   :  { %216 = vrot.lane.b32.xlu0 %v631_v49, %s746_s5 }
 0x299   :  { %225 = vrot.lane.b32.xlu0 %v103_v51, %s735_s25 }
 0x29d   :  { %310 = vrot.lane.b32.xlu0 %v105_v53, %s735_s25 }
 0x307   :  { %v217_v54 = vpop.permute.xlu0 %216 }
 0x308   :  { %v219_v55 = vmul.f32 %v629_v30, %v217_v54 }
 0x30a   :  { %221 = vrot.lane.b32.xlu1 %v219_v55, %s735_s25 }
 0x30b   :  { %v226_v56 = vpop.permute.xlu0 %225 }
 0x30f   :  { %v311_v8 = vpop.permute.xlu0 %310 }
 0x37c   :  { %v222_v57 = vpop.permute.xlu1 %221 }
 0x37d   :  { %v228_v58 = vsel %vm86_vm0, %v222_v57, %v226_v56 }
 0x37e   :  { %562 = vmatmul.mubr.msk.f32.vlgmr.msra.gmra.mrb[0].mxu1 %vm84_vm1, %v228_v58 }
 0x37f   :  { %577 = vmatprep.mubr.msk.f32.mxu1 %vm745_vm2, %v743_v0  ;;  %576 = vmatpush3.xpose.msra.mxu1 %v82_v22 }
 0x451   :  { %v298_v60 = vpop.f32.mrb[0].mxu1 }
 0x452   :  { %v299_v61 = vadd.f32 %v298_v60, %v76_v59  ;;  %v563_v62 = vpop.f32.mrb[1].mxu1 }
 0x454   :  { %632 = vtanh.f32 %v299_v61  ;;  %v499_v2 = vmul.f32 -1.442695, %v299_v61 }
 0x456   :  { %634 = vpow2.f32 %v499_v2 }
 0x45e   :  { %v633_v63 = vpop.eup %632 }
 0x45f   :  { %315 = vrot.lane.b32.xlu1 %v633_v63, %s746_s5 }
 0x460   :  { %v635_v3 = vpop.eup %634 }
 0x461   :  { %v305_v4 = vadd.f32 1.0, %v635_v3 }
 0x463   :  { %636 = vrcp.f32 %v305_v4 }
 0x46d   :  { %v637_v5 = vpop.eup %636 }
 0x46e   :  { %v313_v0 = vmul.f32 %v637_v5, %v311_v8 }
 0x4d1   :  { %v316_v6 = vpop.permute.xlu1 %315 }
 0x4d2   :  { %v318_v7 = vmul.f32 %v637_v5, %v316_v6 }
 0x4d4   :  { %320 = vrot.lane.b32.xlu1 %v318_v7, %s735_s25 }
 0x546   :  { %v321_v9 = vpop.permute.xlu1 %320 }
 0x547   :  { %v323_v10 = vadd.f32 %v321_v9, %v313_v0 }
 0x549   :  { %638 = vtanh.f32 %v323_v10 }
 0x553   :  { %v639_v17 = vpop.eup %638 }
 0x554   :  { %326 = vrot.lane.b32.xlu0 %v639_v17, %s746_s5 }
 0x5c6   :  { %v327_v18 = vpop.permute.xlu0 %326 }
 0x5c7   :  { %v329_v19 = vmul.f32 %v637_v5, %v327_v18 }
 0x5c9   :  { %v330_v20 = vmax.f32 %v329_v19, 0.0 }
 0x5cb   :  { %332 = vrot.lane.b32.xlu1 %v330_v20, %s735_s25  ;;  %s706_s25 = scalar_lea.vmem %s486_s8, 128 }
 0x5cc   :  { %p707_p10 = scmp.ne.s32.totalorder %s486_s8, %s706_s25  ;;  %p712_p12 = scmp.lt.s32.totalorder %s706_s25, %s706_s25 }
 0x5ce   :  { %p713_p13 = por %p712_p12, %p711_p11 }
 0x5d0   :  { %p714_p0 = pnand %p713_p13, %p707_p10 }
 0x63d   :  { %v333_v21 = vpop.permute.xlu1 %332 }
 0x63e   :  { %573 = vmatmul.mubr.msk.f32.vlgmr.msra.gmra.mrb[2].mxu0 %vm86_vm0, %v333_v21 }
 0x711   :  { %v402_v24 = vpop.f32.mrb[2].mxu0 }
 0x712   :  { %v403_v25 = vadd.f32 %v402_v24, %v81_v23  ;;  %v574_v26 = vpop.f32.mrb[3].mxu0 }
 0x714   :  { %v406_v27 = vmax.f32 %v403_v25, 0.0 }
 0x716   :  { %578 = vmatmul.mubr.f32.vlgmr.msra.gmra.mrb[2].mxu1 %v406_v27 }
 0x7e9   :  { %v473_v28 = vpop.f32.mrb[2].mxu1 }
 0x7ea   :  { %v474_v29 = vadd.f32 %v473_v28, %v83_v1  ;;  %v579_v30 = vpop.f32.mrb[3].mxu1 }
 0x7ec   :  { %478 = vst.msk [vmem:[#allocation10] sm:$0xff] %vm477_vm6, %v474_v29 }
 0x7ed   :  { %717 = shalt.err (!%p714_p0)
}
 0x7ee   :  { %s718_s11 = scalar_lea.hbm %s882_s4, 128 }
 0x7ef   :  { %p719_p1 = scmp.ne.s32.totalorder %s882_s4, %s718_s11  ;;  %p722_p2 = scmp.lt.u32.totalorder %s718_s11, %s882_s4 }
 0x7f1   :  { %p724_p3 = pnand %p722_p2, %p719_p1 }
 0x7f3   :  { %727 = shalt.err (!%p724_p3)
}
 0x7f4   :  { %488 = dma.vmem_to_hbm [thread:$0]  %s486_s8, 128, %s882_s4, [#allocation6]  }
 0x7f5   :  { %732 = dma.done.wait [#allocation6], 128  }
 0x7f6   :  { %733 = vsyncadd [#allocation6], 4294967168 }
 0x7f7   :  { %492 = vsyncpa [#allocation5], 1 }
 0x7f8   :  { %493 = vsyncpa [#allocation8], 1 }
 0x7f9   :  { %494 = vsyncpa [#allocation6], 1 }

</bundles_post_ra>
